<compile_context>
chip_gen: v7x
topology: tpu7x:2x2x1
jax: 0.10.0
libtpu: 0.0.40
codegen_flags: <defaults>
</compile_context>

<pallas_src>
import functools

import jax
import jax.numpy as jnp
from jax.experimental import pallas as pl
from jax.experimental.pallas import tpu as pltpu

D_IN, D_HID, D_OUT = 784, 256, 10
K_PAD = 896   # 7 * 128: lane-aligned feature dim
N_PAD = 128   # lane-dense output slab (true outputs live in the first 10 lanes)


def _round_up(n: int, m: int) -> int:
    return ((n + m - 1) // m) * m


def mlp_kernel(x_ref, w1_ref, b1_ref, w2_ref, b2_ref, o_ref):
    # x_ref: (TM, 896) bf16   w1_ref: (896, 256) bf16   b1_ref: (1, 256) f32
    # w2_ref: (256, 128) bf16 b2_ref: (1, 128) f32      o_ref: (TM, 128) f32
    h = jnp.dot(x_ref[...], w1_ref[...], preferred_element_type=jnp.float32)
    h = jnp.maximum(h + b1_ref[...], 0.0)                      # f32 epilogue
    y = jnp.dot(h.astype(jnp.bfloat16), w2_ref[...],
                preferred_element_type=jnp.float32)
    o_ref[...] = y + b2_ref[...]


@functools.partial(jax.jit, static_argnames=("tm",))
def mlp_forward(x, w1, b1, w2, b2, tm: int = 256):
    x_flat = x.reshape(-1, D_IN).astype(jnp.float32)
    B = x_flat.shape[0]

    # Full tiles of `tm` rows; at tiny B just use one 8-row-aligned tile.
    tm = min(tm, _round_up(B, 8))
    Bp = _round_up(B, tm)

    # Pad + cast operands: batch B -> Bp, K 784 -> 896, N 10 -> 128, bf16 MXU inputs.
    x_p = jnp.zeros((Bp, K_PAD), jnp.bfloat16).at[:B, :D_IN].set(
        x_flat.astype(jnp.bfloat16))
    w1_p = jnp.zeros((K_PAD, D_HID), jnp.bfloat16).at[:D_IN, :].set(
        w1.astype(jnp.bfloat16))
    b1_p = b1.reshape(1, D_HID).astype(jnp.float32)
    w2_p = jnp.zeros((D_HID, N_PAD), jnp.bfloat16).at[:, :D_OUT].set(
        w2.astype(jnp.bfloat16))
    b2_p = jnp.zeros((1, N_PAD), jnp.float32).at[:, :D_OUT].set(
        b2.astype(jnp.float32))

    grid = (Bp // tm,)
    cost = pl.CostEstimate(
        flops=2 * Bp * (K_PAD * D_HID + D_HID * N_PAD),
        transcendentals=0,
        bytes_accessed=(Bp * K_PAD * 2 + K_PAD * D_HID * 2
                        + D_HID * N_PAD * 2 + Bp * N_PAD * 4),
    )

    out_padded = pl.pallas_call(
        mlp_kernel,
        out_shape=jax.ShapeDtypeStruct((Bp, N_PAD), jnp.float32),
        grid=grid,
        in_specs=[
            pl.BlockSpec((tm, K_PAD), lambda i: (i, 0)),     # x: tiled over batch
            pl.BlockSpec((K_PAD, D_HID), lambda i: (0, 0)),  # weights stay resident
            pl.BlockSpec((1, D_HID), lambda i: (0, 0)),
            pl.BlockSpec((D_HID, N_PAD), lambda i: (0, 0)),
            pl.BlockSpec((1, N_PAD), lambda i: (0, 0)),
        ],
        out_specs=pl.BlockSpec((tm, N_PAD), lambda i: (i, 0)),
        compiler_params=pltpu.CompilerParams(
            dimension_semantics=("parallel",),
            vmem_limit_bytes=32 * 1024 * 1024,
        ),
        cost_estimate=cost,
    )(x_p, w1_p, b1_p, w2_p, b2_p)

    return out_padded[:B, :D_OUT]


def reference_forward(x, w1, b1, w2, b2):
    X = x.reshape(-1, D_IN).astype(jnp.float32)
    H = jnp.maximum(X @ w1 + b1, 0.0)
    return H @ w2 + b2


if __name__ == "__main__":
    key = jax.random.PRNGKey(0)
    kx, kw1, kw2 = jax.random.split(key, 3)

    # Deterministic parameters matching the PyTorch module's shapes / scale.
    w1 = jax.random.normal(kw1, (D_IN, D_HID), dtype=jnp.float32) * 0.01
    b1 = jnp.zeros((D_HID,), dtype=jnp.float32)
    w2 = jax.random.normal(kw2, (D_HID, D_OUT), dtype=jnp.float32) * 0.01
    b2 = jnp.zeros((D_OUT,), dtype=jnp.float32)

    # Small MNIST-like input; forward flattens to (-1, 784).
    x = jax.random.normal(kx, (2, 1, 28, 28), dtype=jnp.float32)

    out = mlp_forward(x, w1, b1, w2, b2)
    jax.block_until_ready(out)

    ref = reference_forward(x, w1, b1, w2, b2)
    assert out.shape == (2, D_OUT)
    # bf16 MXU operands -> bf16-level tolerance vs. the f32 reference.
    assert jnp.allclose(out, ref, atol=1e-2, rtol=1e-2), "mismatch vs reference"

    print("KERNEL_OK")
</pallas_src>

<mosaic_0001>
module attributes {stable_mosaic.version = 11 : i64} {
  func.func @mlp_kernel(%arg0: i32, %arg1: memref<8x896xbf16, #tpu.memory_space<vmem>>, %arg2: memref<896x256xbf16, #tpu.memory_space<vmem>>, %arg3: memref<1x256xf32, #tpu.memory_space<vmem>>, %arg4: memref<256x128xbf16, #tpu.memory_space<vmem>>, %arg5: memref<1x128xf32, #tpu.memory_space<vmem>>, %arg6: memref<8x128xf32, #tpu.memory_space<vmem>>) attributes {dimension_semantics = [#tpu.dimension_semantics<parallel>], iteration_bounds = array<i64: 1>, scalar_prefetch = 0 : i64, scratch_operands = 0 : i64, tpu.core_type = #tpu.core_type<tc>, window_params = [{transform_indices = @transform_0, window_bounds = array<i64: 8, 896>}, {pipeline_mode = #tpu.pipeline_mode<synchronous>, transform_indices = @transform_1, window_bounds = array<i64: 896, 256>}, {pipeline_mode = #tpu.pipeline_mode<synchronous>, transform_indices = @transform_2, window_bounds = array<i64: 1, 256>}, {pipeline_mode = #tpu.pipeline_mode<synchronous>, transform_indices = @transform_3, window_bounds = array<i64: 256, 128>}, {pipeline_mode = #tpu.pipeline_mode<synchronous>, transform_indices = @transform_4, window_bounds = array<i64: 1, 128>}, {transform_indices = @transform_5, window_bounds = array<i64: 8, 128>}]} {
    %c0 = arith.constant 0 : index
    %c0_0 = arith.constant 0 : index
    %0 = vector.load %arg1[%c0, %c0_0] : memref<8x896xbf16, #tpu.memory_space<vmem>>, vector<8x896xbf16>
    %c0_1 = arith.constant 0 : index
    %c0_2 = arith.constant 0 : index
    %1 = vector.load %arg2[%c0_1, %c0_2] : memref<896x256xbf16, #tpu.memory_space<vmem>>, vector<896x256xbf16>
    %cst = arith.constant dense<0.000000e+00> : vector<8x256xf32>
    %2 = tpu.matmul %0, %1, %cst {dimension_numbers = #tpu.dot_dimension_numbers<[1], [0], [0], [1], [0, 0, 1, 1], [], []>} : vector<8x896xbf16>, vector<896x256xbf16>, vector<8x256xf32> -> vector<8x256xf32>
    %c0_3 = arith.constant 0 : index
    %c0_4 = arith.constant 0 : index
    %3 = vector.load %arg3[%c0_3, %c0_4] : memref<1x256xf32, #tpu.memory_space<vmem>>, vector<1x256xf32>
    %4 = vector.broadcast %3 : vector<1x256xf32> to vector<8x256xf32>
    %5 = arith.addf %2, %4 : vector<8x256xf32>
    %cst_5 = arith.constant 0.000000e+00 : f32
    %6 = vector.broadcast %cst_5 : f32 to vector<8x256xf32>
    %7 = arith.maximumf %5, %6 : vector<8x256xf32>
    %8 = arith.truncf %7 : vector<8x256xf32> to vector<8x256xbf16>
    %c0_6 = arith.constant 0 : index
    %c0_7 = arith.constant 0 : index
    %9 = vector.load %arg4[%c0_6, %c0_7] : memref<256x128xbf16, #tpu.memory_space<vmem>>, vector<256x128xbf16>
    %cst_8 = arith.constant dense<0.000000e+00> : vector<8x128xf32>
    %10 = tpu.matmul %8, %9, %cst_8 {dimension_numbers = #tpu.dot_dimension_numbers<[1], [0], [0], [1], [0, 0, 1, 1], [], []>} : vector<8x256xbf16>, vector<256x128xbf16>, vector<8x128xf32> -> vector<8x128xf32>
    %c0_9 = arith.constant 0 : index
    %c0_10 = arith.constant 0 : index
    %11 = vector.load %arg5[%c0_9, %c0_10] : memref<1x128xf32, #tpu.memory_space<vmem>>, vector<1x128xf32>
    %12 = vector.broadcast %11 : vector<1x128xf32> to vector<8x128xf32>
    %13 = arith.addf %10, %12 : vector<8x128xf32>
    %c0_11 = arith.constant 0 : index
    %c0_12 = arith.constant 0 : index
    %14 = vector.load %arg6[%c0_11, %c0_12] : memref<8x128xf32, #tpu.memory_space<vmem>>, vector<8x128xf32>
    tpu.vector_store %arg6[%c0_11, %c0_12], %13 {strides = array<i32>} : memref<8x128xf32, #tpu.memory_space<vmem>>, vector<8x128xf32>,
    return
  }
  func.func @transform_0(%arg0: i32) -> (i32, i32) {
    %c0_i32 = arith.constant 0 : i32
    %c0_i32_0 = arith.constant 0 : i32
    return %arg0, %c0_i32 : i32, i32
  }
  func.func @transform_1(%arg0: i32) -> (i32, i32) {
    %c0_i32 = arith.constant 0 : i32
    %c0_i32_0 = arith.constant 0 : i32
    %c0_i32_1 = arith.constant 0 : i32
    return %c0_i32, %c0_i32_0 : i32, i32
  }
  func.func @transform_2(%arg0: i32) -> (i32, i32) {
    %c0_i32 = arith.constant 0 : i32
    %c0_i32_0 = arith.constant 0 : i32
    %c0_i32_1 = arith.constant 0 : i32
    return %c0_i32, %c0_i32_0 : i32, i32
  }
  func.func @transform_3(%arg0: i32) -> (i32, i32) {
    %c0_i32 = arith.constant 0 : i32
    %c0_i32_0 = arith.constant 0 : i32
    %c0_i32_1 = arith.constant 0 : i32
    return %c0_i32, %c0_i32_0 : i32, i32
  }
  func.func @transform_4(%arg0: i32) -> (i32, i32) {
    %c0_i32 = arith.constant 0 : i32
    %c0_i32_0 = arith.constant 0 : i32
    %c0_i32_1 = arith.constant 0 : i32
    return %c0_i32, %c0_i32_0 : i32, i32
  }
  func.func @transform_5(%arg0: i32) -> (i32, i32) {
    %c0_i32 = arith.constant 0 : i32
    %c0_i32_0 = arith.constant 0 : i32
    return %arg0, %c0_i32 : i32, i32
  }
}

</mosaic_0001>

<bundles_post_ra>
// kernel: mlp_forward.1
= control target key start
LH: loop header
LB: loop body
LE: loop exit
PB: predicated region body
PF: predicated region fallthrough
CT: control target
= control target key end

     0   :  { %s1890_s1 = inlined_call_operand.vmem [shape: bf16[896,256], index: 1, kind: input, shape index: {}]   ;;  %s1891_s0 = inlined_call_operand.vmem [shape: bf16[8,896], index: 0, kind: input, shape index: {}]   ;;  %s1892_s3 = inlined_call_operand.vmem [shape: bf16[256,128], index: 3, kind: input, shape index: {}]   ;;  %s1893_s2 = inlined_call_operand.vmem [shape: f32[1,256], index: 2, kind: input, shape index: {}]   ;;  %s1894_s4 = inlined_call_operand.vmem [shape: f32[1,128], index: 4, kind: input, shape index: {}]   ;;  %s1895_s5 = inlined_call_operand.vmem [shape: f32[8,128], index: 5, kind: output, shape index: {}]  }
   0x1   :  { %v1251_v0 = vld [vmem:[%s1890_s1 + $0x104] ss:$8 sps:$4 sm:$0xff]   ;;  %v1253_v1 = vld [vmem:[%s1890_s1 + $0x100] ss:$8 sps:$4 sm:$0xff]   ;;  %v1254_v2 = vld [vmem:[%s1890_s1 + $0x114] ss:$8 sps:$4 sm:$0xff]  }
   0x2   :  { %775 = vmatprep.subr.bf16.mxu0 %v1251_v0  ;;  %v1256_v3 = vld [vmem:[%s1890_s1 + $0x110] ss:$8 sps:$4 sm:$0xff]   ;;  %v1257_v4 = vld [vmem:[%s1890_s1 + $0x124] ss:$8 sps:$4 sm:$0xff]   ;;  %v1259_v5 = vld [vmem:[%s1890_s1 + $0x120] ss:$8 sps:$4 sm:$0xff]  }
   0x3   :  { %776 = vmatpush1.bf16.msra.mxu0 %v1253_v1  ;;  %v1260_v6 = vld [vmem:[%s1890_s1 + $0x134] ss:$8 sps:$4 sm:$0xff]   ;;  %v1262_v7 = vld [vmem:[%s1890_s1 + $0x130] ss:$8 sps:$4 sm:$0xff]   ;;  %v1275_v8 = vld [vmem:[%s1890_s1 + $0x4] ss:$8 sps:$4 sm:$0xff]  }
   0x4   :  { %777 = vmatprep.subr.bf16.mxu0 %v1254_v2  ;;  %v1277_v9 = vld [vmem:[%s1890_s1] ss:$8 sps:$4 sm:$0xff]   ;;  %v1263_v10 = vld [vmem:[%s1890_s1 + $0x144] ss:$8 sps:$4 sm:$0xff]   ;;  %734 = vmatprep.subr.bf16.mxu1 %v1275_v8  ;;  %v1281_v11 = vld [vmem:[%s1890_s1 + $0x14] ss:$8 sps:$4 sm:$0xff]  }
   0x5   :  { %735 = vmatpush1.bf16.msra.mxu1 %v1277_v9  ;;  %v1283_v12 = vld [vmem:[%s1890_s1 + $0x10] ss:$8 sps:$4 sm:$0xff]   ;;  %v1265_v13 = vld [vmem:[%s1890_s1 + $0x140] ss:$8 sps:$4 sm:$0xff]   ;;  %v1266_v14 = vld [vmem:[%s1890_s1 + $0x154] ss:$8 sps:$4 sm:$0xff]  }
   0x6   :  { %736 = vmatprep.subr.bf16.mxu1 %v1281_v11  ;;  %v1287_v15 = vld [vmem:[%s1890_s1 + $0x24] ss:$8 sps:$4 sm:$0xff]   ;;  %v1289_v16 = vld [vmem:[%s1890_s1 + $0x20] ss:$8 sps:$4 sm:$0xff]   ;;  %v1268_v17 = vld [vmem:[%s1890_s1 + $0x150] ss:$8 sps:$4 sm:$0xff]  }
   0x7   :  { %778 = vmatpush1.bf16.msra.mxu0 %v1256_v3  ;;  %v1293_v18 = vld [vmem:[%s1890_s1 + $0x34] ss:$8 sps:$4 sm:$0xff]   ;;  %v1269_v19 = vld [vmem:[%s1890_s1 + $0x164] ss:$8 sps:$4 sm:$0xff]   ;;  %v1295_v20 = vld [vmem:[%s1890_s1 + $0x30] ss:$8 sps:$4 sm:$0xff]  }
   0x8   :  { %779 = vmatprep.subr.bf16.mxu0 %v1257_v4  ;;  %v1271_v21 = vld [vmem:[%s1890_s1 + $0x160] ss:$8 sps:$4 sm:$0xff]   ;;  %v1299_v22 = vld [vmem:[%s1890_s1 + $0x44] ss:$8 sps:$4 sm:$0xff]   ;;  %v1272_v23 = vld [vmem:[%s1890_s1 + $0x174] ss:$8 sps:$4 sm:$0xff]  }
   0x9   :  { %737 = vmatpush1.bf16.msra.mxu1 %v1283_v12  ;;  %v1301_v24 = vld [vmem:[%s1890_s1 + $0x40] ss:$8 sps:$4 sm:$0xff]   ;;  %v1274_v25 = vld [vmem:[%s1890_s1 + $0x170] ss:$8 sps:$4 sm:$0xff]   ;;  %v1305_v26 = vld [vmem:[%s1890_s1 + $0x54] ss:$8 sps:$4 sm:$0xff]  }
   0xa   :  { %738 = vmatprep.subr.bf16.mxu1 %v1287_v15  ;;  %v1278_v27 = vld [vmem:[%s1890_s1 + $0x184] ss:$8 sps:$4 sm:$0xff]   ;;  %v1307_v28 = vld [vmem:[%s1890_s1 + $0x50] ss:$8 sps:$4 sm:$0xff]   ;;  %v1280_v29 = vld [vmem:[%s1890_s1 + $0x180] ss:$8 sps:$4 sm:$0xff]  }
   0xb   :  { %780 = vmatpush1.bf16.msra.mxu0 %v1259_v5  ;;  %v1311_v30 = vld [vmem:[%s1890_s1 + $0x64] ss:$8 sps:$4 sm:$0xff]   ;;  %v1284_v31 = vld [vmem:[%s1890_s1 + $0x194] ss:$8 sps:$4 sm:$0xff]   ;;  %v1286_v33 = vld [vmem:[%s1890_s1 + $0x190] ss:$8 sps:$4 sm:$0xff]  }
   0xc   :  { %781 = vmatprep.subr.bf16.mxu0 %v1260_v6  ;;  %v1572_v32 = vld [vmem:[%s1891_s0 + $0x8] sm:$0xff]  ;;  %v1317_v36 = vld [vmem:[%s1890_s1 + $0x74] ss:$8 sps:$4 sm:$0xff]   ;;  %v1319_v39 = vld [vmem:[%s1890_s1 + $0x70] ss:$8 sps:$4 sm:$0xff]  }
   0xd   :  { %739 = vmatpush1.bf16.msra.mxu1 %v1289_v16  ;;  %v1313_v34 = vld [vmem:[%s1890_s1 + $0x60] ss:$8 sps:$4 sm:$0xff]   ;;  %v1085_v35 = vcombine.high %v1572_v32, %v1572_v32  ;;  %v1290_v37 = vld [vmem:[%s1890_s1 + $0x1a4] ss:$8 sps:$4 sm:$0xff]   ;;  %v1296_v41 = vld [vmem:[%s1890_s1 + $0x1b4] ss:$8 sps:$4 sm:$0xff]   ;;  %v1084_v1 = vcombine.low %v1572_v32, %v1572_v32 }
   0xe   :  { %740 = vmatprep.subr.bf16.mxu1 %v1293_v18  ;;  %v1292_v38 = vld [vmem:[%s1890_s1 + $0x1a0] ss:$8 sps:$4 sm:$0xff]   ;;  %v1323_v40 = vld [vmem:[%s1890_s1 + $0x84] ss:$8 sps:$4 sm:$0xff]   ;;  %v1298_v42 = vld [vmem:[%s1890_s1 + $0x1b0] ss:$8 sps:$4 sm:$0xff]  }
   0xf   :  { %782 = vmatpush1.bf16.msra.mxu0 %v1262_v7  ;;  %807 = vmatprep.mubr.bf16.mxu0 %v1085_v35  ;;  %v1325_v43 = vld [vmem:[%s1890_s1 + $0x80] ss:$8 sps:$4 sm:$0xff]   ;;  %v1331_v44 = vld [vmem:[%s1890_s1 + $0x94] ss:$8 sps:$4 sm:$0xff]   ;;  %v1302_v45 = vld [vmem:[%s1890_s1 + $0x1c4] ss:$8 sps:$4 sm:$0xff]  }
  0x10   :  { %783 = vmatprep.subr.bf16.mxu0 %v1263_v10  ;;  %v1304_v46 = vld [vmem:[%s1890_s1 + $0x1c0] ss:$8 sps:$4 sm:$0xff]   ;;  %v1333_v47 = vld [vmem:[%s1890_s1 + $0x90] ss:$8 sps:$4 sm:$0xff]   ;;  %v1337_v48 = vld [vmem:[%s1890_s1 + $0xa4] ss:$8 sps:$4 sm:$0xff]  }
  0x11   :  { %741 = vmatpush1.bf16.msra.mxu1 %v1295_v20  ;;  %v1308_v49 = vld [vmem:[%s1890_s1 + $0x1d4] ss:$8 sps:$4 sm:$0xff]   ;;  %v1310_v50 = vld [vmem:[%s1890_s1 + $0x1d0] ss:$8 sps:$4 sm:$0xff]   ;;  %v1339_v51 = vld [vmem:[%s1890_s1 + $0xa0] ss:$8 sps:$4 sm:$0xff]  }
  0x12   :  { %742 = vmatprep.subr.bf16.mxu1 %v1299_v22  ;;  %v1343_v52 = vld [vmem:[%s1890_s1 + $0xb4] ss:$8 sps:$4 sm:$0xff]   ;;  %v1314_v53 = vld [vmem:[%s1890_s1 + $0x1e4] ss:$8 sps:$4 sm:$0xff]   ;;  %v1316_v54 = vld [vmem:[%s1890_s1 + $0x1e0] ss:$8 sps:$4 sm:$0xff]  }
  0x13   :  { %784 = vmatpush1.bf16.msra.mxu0 %v1265_v13  ;;  %v21_v55 = vld [vmem:[%s1891_s0] sm:$0xff]  ;;  %v1345_v56 = vld [vmem:[%s1890_s1 + $0xb0] ss:$8 sps:$4 sm:$0xff]   ;;  %v1320_v59 = vld [vmem:[%s1890_s1 + $0x1f4] ss:$8 sps:$4 sm:$0xff]  }
  0x14   :  { %785 = vmatprep.subr.bf16.mxu0 %v1266_v14  ;;  %v1083_v57 = vcombine.high %v21_v55, %v21_v55  ;;  %v1349_v58 = vld [vmem:[%s1890_s1 + $0xc4] ss:$8 sps:$4 sm:$0xff]   ;;  %v1322_v60 = vld [vmem:[%s1890_s1 + $0x1f0] ss:$8 sps:$4 sm:$0xff]   ;;  %v1351_v61 = vld [vmem:[%s1890_s1 + $0xc0] ss:$8 sps:$4 sm:$0xff]   ;;  %v1082_v14 = vcombine.low %v21_v55, %v21_v55 }
  0x15   :  { %743 = vmatpush1.bf16.msra.mxu1 %v1301_v24  ;;  %v1355_v62 = vld [vmem:[%s1890_s1 + $0xd4] ss:$8 sps:$4 sm:$0xff]   ;;  %v1330_v63 = vld [vmem:[%s1890_s1 + $0x204] ss:$8 sps:$4 sm:$0xff]   ;;  %v1328_v0 = vld [vmem:[%s1890_s1 + $0x200] ss:$8 sps:$4 sm:$0xff]  }
  0x16   :  { %744 = vmatprep.subr.bf16.mxu1 %v1305_v26  ;;  %766 = vmatprep.mubr.bf16.mxu1 %v1083_v57  ;;  %v1357_v2 = vld [vmem:[%s1890_s1 + $0xd0] ss:$8 sps:$4 sm:$0xff]   ;;  %v1361_v3 = vld [vmem:[%s1890_s1 + $0xe4] ss:$8 sps:$4 sm:$0xff]   ;;  %v1336_v4 = vld [vmem:[%s1890_s1 + $0x214] ss:$8 sps:$4 sm:$0xff]  }
  0x17   :  { %786 = vmatpush1.bf16.msra.mxu0 %v1268_v17  ;;  %v1334_v5 = vld [vmem:[%s1890_s1 + $0x210] ss:$8 sps:$4 sm:$0xff]   ;;  %v1363_v6 = vld [vmem:[%s1890_s1 + $0xe0] ss:$8 sps:$4 sm:$0xff]   ;;  %v1367_v7 = vld [vmem:[%s1890_s1 + $0xf4] ss:$8 sps:$4 sm:$0xff]  }
  0x18   :  { %787 = vmatprep.subr.bf16.mxu0 %v1269_v19  ;;  %v1342_v8 = vld [vmem:[%s1890_s1 + $0x224] ss:$8 sps:$4 sm:$0xff]   ;;  %v1340_v9 = vld [vmem:[%s1890_s1 + $0x220] ss:$8 sps:$4 sm:$0xff]   ;;  %v1369_v10 = vld [vmem:[%s1890_s1 + $0xf0] ss:$8 sps:$4 sm:$0xff]  }
  0x19   :  { %745 = vmatpush1.bf16.msra.mxu1 %v1307_v28  ;;  %v1377_v11 = vld [vmem:[%s1890_s1 + $0x304] ss:$8 sps:$4 sm:$0xff]   ;;  %v1348_v12 = vld [vmem:[%s1890_s1 + $0x234] ss:$8 sps:$4 sm:$0xff]   ;;  %v1346_v13 = vld [vmem:[%s1890_s1 + $0x230] ss:$8 sps:$4 sm:$0xff]  }
  0x1a   :  { %746 = vmatprep.subr.bf16.mxu1 %v1311_v30  ;;  %v1375_v15 = vld [vmem:[%s1890_s1 + $0x300] ss:$8 sps:$4 sm:$0xff]   ;;  %v1383_v16 = vld [vmem:[%s1890_s1 + $0x314] ss:$8 sps:$4 sm:$0xff]   ;;  %v1354_v18 = vld [vmem:[%s1890_s1 + $0x244] ss:$8 sps:$4 sm:$0xff]  }
  0x1b   :  { %788 = vmatpush1.bf16.msra.mxu0 %v1271_v21  ;;  %v1713_v17 = vld [vmem:[%s1891_s0 + $0x10] sm:$0xff]  ;;  %v1442_v21 = vmov 0   ;;  %v1352_v22 = vld [vmem:[%s1890_s1 + $0x240] ss:$8 sps:$4 sm:$0xff]   ;;  %v1366_v28 = vld [vmem:[%s1890_s1 + $0x264] ss:$8 sps:$4 sm:$0xff]  }
  0x1c   :  { %789 = vmatprep.subr.bf16.mxu0 %v1272_v23  ;;  %v1087_v19 = vcombine.high %v1713_v17, %v1713_v17  ;;  %v1381_v20 = vld [vmem:[%s1890_s1 + $0x310] ss:$8 sps:$4 sm:$0xff]   ;;  %v1389_v23 = vld [vmem:[%s1890_s1 + $0x324] ss:$8 sps:$4 sm:$0xff]   ;;  %v1360_v24 = vld [vmem:[%s1890_s1 + $0x254] ss:$8 sps:$4 sm:$0xff]  }
  0x1d   :  { %747 = vmatpush1.bf16.msra.mxu1 %v1313_v34  ;;  %v1358_v26 = vld [vmem:[%s1890_s1 + $0x250] ss:$8 sps:$4 sm:$0xff]   ;;  %v1364_v30 = vld [vmem:[%s1890_s1 + $0x260] ss:$8 sps:$4 sm:$0xff]   ;;  %v1372_v32 = vld [vmem:[%s1890_s1 + $0x274] ss:$8 sps:$4 sm:$0xff]  }
  0x1e   :  { %748 = vmatprep.subr.bf16.mxu1 %v1317_v36  ;;  %v1370_v34 = vld [vmem:[%s1890_s1 + $0x270] ss:$8 sps:$4 sm:$0xff]   ;;  %v1407_v35 = vld [vmem:[%s1890_s1 + $0x354] ss:$8 sps:$4 sm:$0xff]   ;;  %v1380_v36 = vld [vmem:[%s1890_s1 + $0x284] ss:$8 sps:$4 sm:$0xff]  }
  0x1f   :  { %790 = vmatpush1.bf16.msra.mxu0 %v1274_v25  ;;  %v1387_v25 = vld [vmem:[%s1890_s1 + $0x320] ss:$8 sps:$4 sm:$0xff]   ;;  %v1420_v57 = vld [vmem:[%s1890_s1 + $0x2f0] ss:$8 sps:$4 sm:$0xff]  }
  0x20   :  { %791 = vmatprep.subr.bf16.mxu0 %v1278_v27  ;;  %v1395_v27 = vld [vmem:[%s1890_s1 + $0x334] ss:$8 sps:$4 sm:$0xff]   ;;  %v1414_v55 = vld [vmem:[%s1890_s1 + $0x2e0] ss:$8 sps:$4 sm:$0xff]  }
  0x21   :  { %749 = vmatpush1.bf16.msra.mxu1 %v1319_v39  ;;  %v1413_v39 = vld [vmem:[%s1890_s1 + $0x364] ss:$8 sps:$4 sm:$0xff]  }
  0x22   :  { %750 = vmatprep.subr.bf16.mxu1 %v1323_v40  ;;  %v1386_v40 = vld [vmem:[%s1890_s1 + $0x294] ss:$8 sps:$4 sm:$0xff]  }
  0x23   :  { %792 = vmatpush1.bf16.msra.mxu0 %v1280_v29  ;;  %v1393_v29 = vld [vmem:[%s1890_s1 + $0x330] ss:$8 sps:$4 sm:$0xff]  }
  0x24   :  { %793 = vmatprep.subr.bf16.mxu0 %v1284_v31  ;;  %v1401_v31 = vld [vmem:[%s1890_s1 + $0x344] ss:$8 sps:$4 sm:$0xff]  }
  0x25   :  { %751 = vmatpush1.bf16.msra.mxu1 %v1325_v43  ;;  %v1419_v43 = vld [vmem:[%s1890_s1 + $0x374] ss:$8 sps:$4 sm:$0xff]  }
  0x26   :  { %752 = vmatprep.subr.bf16.mxu1 %v1331_v44  ;;  %v1392_v44 = vld [vmem:[%s1890_s1 + $0x2a4] ss:$8 sps:$4 sm:$0xff]  }
  0x27   :  { %794 = vmatpush1.bf16.msra.mxu0 %v1286_v33  ;;  %v1399_v33 = vld [vmem:[%s1890_s1 + $0x340] ss:$8 sps:$4 sm:$0xff]  }
  0x28   :  { %795 = vmatprep.subr.bf16.mxu0 %v1290_v37  ;;  %v1405_v37 = vld [vmem:[%s1890_s1 + $0x350] ss:$8 sps:$4 sm:$0xff]  }
  0x29   :  { %753 = vmatpush1.bf16.msra.mxu1 %v1333_v47  ;;  %v1398_v47 = vld [vmem:[%s1890_s1 + $0x2b4] ss:$8 sps:$4 sm:$0xff]  }
  0x2a   :  { %754 = vmatprep.subr.bf16.mxu1 %v1337_v48  ;;  %v1425_v48 = vld [vmem:[%s1891_s0 + $0x18] ss:$0 sps:$4 sm:$0xff]  }
  0x2b   :  { %796 = vmatpush1.bf16.msra.mxu0 %v1292_v38  ;;  %v1378_v38 = vld [vmem:[%s1890_s1 + $0x280] ss:$8 sps:$4 sm:$0xff]  }
  0x2c   :  { %797 = vmatprep.subr.bf16.mxu0 %v1296_v41  ;;  %v1411_v41 = vld [vmem:[%s1890_s1 + $0x360] ss:$8 sps:$4 sm:$0xff]  }
  0x2d   :  { %755 = vmatpush1.bf16.msra.mxu1 %v1339_v51  ;;  %v1402_v51 = vld [vmem:[%s1890_s1 + $0x2c0] ss:$8 sps:$4 sm:$0xff]  }
  0x2e   :  { %756 = vmatprep.subr.bf16.mxu1 %v1343_v52  ;;  %v1410_v52 = vld [vmem:[%s1890_s1 + $0x2d4] ss:$8 sps:$4 sm:$0xff]  }
  0x2f   :  { %798 = vmatpush1.bf16.msra.mxu0 %v1298_v42  ;;  %v1384_v42 = vld [vmem:[%s1890_s1 + $0x290] ss:$8 sps:$4 sm:$0xff]  }
  0x30   :  { %799 = vmatprep.subr.bf16.mxu0 %v1302_v45  ;;  %v1417_v45 = vld [vmem:[%s1890_s1 + $0x370] ss:$8 sps:$4 sm:$0xff]  }
  0x31   :  { %757 = vmatpush1.bf16.msra.mxu1 %v1345_v56  ;;  %v1422_v56 = vld [vmem:[%s1890_s1 + $0x2f4] ss:$8 sps:$4 sm:$0xff]  }
  0x32   :  { %758 = vmatprep.subr.bf16.mxu1 %v1349_v58  ;;  %v1086_v58 = vcombine.low %v1713_v17, %v1713_v17 }
  0x33   :  { %800 = vmatpush1.bf16.msra.mxu0 %v1304_v46  ;;  %v1390_v46 = vld [vmem:[%s1890_s1 + $0x2a0] ss:$8 sps:$4 sm:$0xff]  }
  0x34   :  { %801 = vmatprep.subr.bf16.mxu0 %v1308_v49  ;;  %v1396_v49 = vld [vmem:[%s1890_s1 + $0x2b0] ss:$8 sps:$4 sm:$0xff]  }
  0x35   :  { %759 = vmatpush1.bf16.msra.mxu1 %v1351_v61  ;;  %v1428_v61 = vld [vmem:[%s1892_s3 + $0x48] sm:$0xff]  }
  0x36   :  { %760 = vmatprep.subr.bf16.mxu1 %v1355_v62  ;;  %v1429_v62 = vld [vmem:[%s1892_s3 + $0x8] sm:$0xff]  }
  0x37   :  { %802 = vmatpush1.bf16.msra.mxu0 %v1310_v50  ;;  %v1404_v50 = vld [vmem:[%s1890_s1 + $0x2c4] ss:$8 sps:$4 sm:$0xff]  }
  0x38   :  { %803 = vmatprep.subr.bf16.mxu0 %v1314_v53  ;;  %v1408_v53 = vld [vmem:[%s1890_s1 + $0x2d0] ss:$8 sps:$4 sm:$0xff]  }
  0x39   :  { %761 = vmatpush1.bf16.msra.mxu1 %v1357_v2  ;;  %v1433_v2 = vld [vmem:[%s1892_s3 + $0x18] sm:$0xff]  }
  0x3a   :  { %762 = vmatprep.subr.bf16.mxu1 %v1361_v3  ;;  %v1434_v3 = vld [vmem:[%s1892_s3 + $0x60] sm:$0xff]  }
  0x3b   :  { %804 = vmatpush1.bf16.msra.mxu0 %v1316_v54  ;;  %v1416_v54 = vld [vmem:[%s1890_s1 + $0x2e4] ss:$8 sps:$4 sm:$0xff]  }
  0x3c   :  { %805 = vmatprep.subr.bf16.mxu0 %v1320_v59  ;;  %v1426_v59 = vld [vmem:[%s1892_s3 + $0x40] sm:$0xff]  }
  0x3d   :  { %763 = vmatpush1.bf16.msra.mxu1 %v1363_v6  ;;  %v1437_v6 = vld [vmem:[%s1892_s3 + $0x28] sm:$0xff]  }
  0x3e   :  { %764 = vmatprep.subr.bf16.mxu1 %v1367_v7  ;;  %v1438_v7 = vld [vmem:[%s1892_s3 + $0x70] sm:$0xff]  }
  0x3f   :  { %806 = vmatpush1.bf16.msra.mxu0 %v1322_v60  ;;  %v1427_v60 = vld [vmem:[%s1892_s3] sm:$0xff]  }
  0x40   :  { %816 = vmatprep.subr.bf16.mxu0 %v1330_v63  ;;  %v1430_v63 = vld [vmem:[%s1892_s3 + $0x50] sm:$0xff]  }
  0x41   :  { %765 = vmatpush1.bf16.msra.mxu1 %v1369_v10  ;;  %v1441_v10 = vld [vmem:[%s1892_s3 + $0x38] sm:$0xff]  }
  0x42   :  { %808 = vmatmul.mubr.bf16.vlgmr.msra.gmra.mrb[0].mxu0 %v1084_v1  ;;  %857 = vmatprep.subr.bf16.mxu1 %v1377_v11  ;;  %v1432_v1 = vld [vmem:[%s1892_s3 + $0x58] sm:$0xff]  }
  0x43   :  { %817 = vmatpush1.bf16.msra.mxu0 %v1328_v0  ;;  %848 = vmatprep.mubr.bf16.mxu0 %v1087_v19  ;;  %v1431_v0 = vld [vmem:[%s1892_s3 + $0x10] sm:$0xff]   ;;  %v139_v19 = vlaneseq }
  0x44   :  { %818 = vmatprep.subr.bf16.mxu0 %v1336_v4  ;;  %767 = vmatmul.mubr.bf16.vlgmr.msra.gmra.mrb[0].mxu1 %v1082_v14  ;;  %v1435_v4 = vld [vmem:[%s1892_s3 + $0x20] sm:$0xff]  }
  0x45   :  { %858 = vmatpush1.bf16.msra.mxu1 %v1375_v15  ;;  %889 = vmatprep.mubr.bf16.mxu1 %v1442_v21 }
  0x46   :  { %859 = vmatprep.subr.bf16.mxu1 %v1383_v16 }
  0x47   :  { %819 = vmatpush1.bf16.msra.mxu0 %v1334_v5  ;;  %v1436_v5 = vld [vmem:[%s1892_s3 + $0x68] sm:$0xff]  }
  0x48   :  { %820 = vmatprep.subr.bf16.mxu0 %v1342_v8  ;;  %v1439_v8 = vld [vmem:[%s1892_s3 + $0x30] sm:$0xff]  }
  0x49   :  { %860 = vmatpush1.bf16.msra.mxu1 %v1381_v20  ;;  %v140_v20 = vshrl.u32 %v139_v19, 7 }
  0x4a   :  { %861 = vmatprep.subr.bf16.mxu1 %v1389_v23 }
  0x4b   :  { %821 = vmatpush1.bf16.msra.mxu0 %v1340_v9  ;;  %v1440_v9 = vld [vmem:[%s1892_s3 + $0x78] sm:$0xff]   ;;  %v141_v21 = vsub.s32 0, %v140_v20  ;;  %v145_v23 = vsub.s32 1, %v140_v20 }
  0x4c   :  { %822 = vmatprep.subr.bf16.mxu0 %v1348_v12 }
  0x4d   :  { %862 = vmatpush1.bf16.msra.mxu1 %v1387_v25 }
  0x4e   :  { %863 = vmatprep.subr.bf16.mxu1 %v1395_v27 }
  0x4f   :  { %823 = vmatpush1.bf16.msra.mxu0 %v1346_v13 }
  0x50   :  { %824 = vmatprep.subr.bf16.mxu0 %v1354_v18 }
  0x51   :  { %864 = vmatpush1.bf16.msra.mxu1 %v1393_v29 }
  0x52   :  { %865 = vmatprep.subr.bf16.mxu1 %v1401_v31 }
  0x53   :  { %825 = vmatpush1.bf16.msra.mxu0 %v1352_v22  ;;  %v137_v22 = vld [vmem:[%s1893_s2] sm:$0x3] }
  0x54   :  { %826 = vmatprep.subr.bf16.mxu0 %v1360_v24  ;;  %v142_v24 = vrot.slane %v137_v22, %v141_v21  ;;  %v146_v25 = vrot.slane %v137_v22, %v145_v23 }
  0x55   :  { %866 = vmatpush1.bf16.msra.mxu1 %v1399_v33 }
  0x56   :  { %867 = vmatprep.subr.bf16.mxu1 %v1407_v35 }
  0x57   :  { %827 = vmatpush1.bf16.msra.mxu0 %v1358_v26 }
  0x58   :  { %828 = vmatprep.subr.bf16.mxu0 %v1366_v28 }
  0x59   :  { %868 = vmatpush1.bf16.msra.mxu1 %v1405_v37 }
  0x5a   :  { %869 = vmatprep.subr.bf16.mxu1 %v1413_v39 }
  0x5b   :  { %829 = vmatpush1.bf16.msra.mxu0 %v1364_v30 }
  0x5c   :  { %830 = vmatprep.subr.bf16.mxu0 %v1372_v32 }
  0x5d   :  { %870 = vmatpush1.bf16.msra.mxu1 %v1411_v41  ;;  %v1201_v41 = vld [vmem:[%s1894_s4] ss:$0 sm:$0xff] }
  0x5e   :  { %871 = vmatprep.subr.bf16.mxu1 %v1419_v43 }
  0x5f   :  { %831 = vmatpush1.bf16.msra.mxu0 %v1370_v34 }
  0x60   :  { %832 = vmatprep.subr.bf16.mxu0 %v1380_v36 }
  0x61   :  { %872 = vmatpush1.bf16.msra.mxu1 %v1417_v45 }
  0x62   :  { %1218 = vmatprep.subr.bf16.mxu1 %v1426_v59 }
  0x63   :  { %833 = vmatpush1.bf16.msra.mxu0 %v1378_v38 }
  0x64   :  { %834 = vmatprep.subr.bf16.mxu0 %v1386_v40  ;;  %890 = vmatmul.mubr.bf16.vlgmr.msra.gmra.mrb[4].mxu1 %v1425_v48 }
  0x65   :  { %1219 = vmatpush3.bf16.msra.mxu1 %v1427_v60 }
  0x66   :  { %1220 = vmatprep.subr.bf16.mxu1 %v1428_v61 }
  0x67   :  { %835 = vmatpush1.bf16.msra.mxu0 %v1384_v42 }
  0x68   :  { %836 = vmatprep.subr.bf16.mxu0 %v1392_v44 }
  0x69   :  { %1221 = vmatpush3.bf16.msra.mxu1 %v1429_v62 }
  0x6a   :  { %1222 = vmatprep.subr.bf16.mxu1 %v1430_v63 }
  0x6b   :  { %837 = vmatpush1.bf16.msra.mxu0 %v1390_v46 }
  0x6c   :  { %838 = vmatprep.subr.bf16.mxu0 %v1398_v47 }
  0x6d   :  { %1223 = vmatpush3.bf16.msra.mxu1 %v1431_v0 }
  0x6e   :  { %1224 = vmatprep.subr.bf16.mxu1 %v1432_v1 }
  0x6f   :  { %839 = vmatpush1.bf16.msra.mxu0 %v1396_v49 }
  0x70   :  { %840 = vmatprep.subr.bf16.mxu0 %v1404_v50 }
  0x71   :  { %1225 = vmatpush3.bf16.msra.mxu1 %v1433_v2 }
  0x72   :  { %1226 = vmatprep.subr.bf16.mxu1 %v1434_v3 }
  0x73   :  { %841 = vmatpush1.bf16.msra.mxu0 %v1402_v51 }
  0x74   :  { %842 = vmatprep.subr.bf16.mxu0 %v1410_v52 }
  0x75   :  { %1227 = vmatpush3.bf16.msra.mxu1 %v1435_v4 }
  0x76   :  { %1228 = vmatprep.subr.bf16.mxu1 %v1436_v5 }
  0x77   :  { %843 = vmatpush1.bf16.msra.mxu0 %v1408_v53 }
  0x78   :  { %844 = vmatprep.subr.bf16.mxu0 %v1416_v54 }
  0x79   :  { %1229 = vmatpush3.bf16.msra.mxu1 %v1437_v6 }
  0x7a   :  { %1230 = vmatprep.subr.bf16.mxu1 %v1438_v7 }
  0x7b   :  { %845 = vmatpush1.bf16.msra.mxu0 %v1414_v55 }
  0x7c   :  { %846 = vmatprep.subr.bf16.mxu0 %v1422_v56 }
  0x7d   :  { %1231 = vmatpush3.bf16.msra.mxu1 %v1439_v8 }
  0x7e   :  { %1232 = vmatprep.subr.bf16.mxu1 %v1440_v9 }
  0x7f   :  { %847 = vmatpush1.bf16.msra.mxu0 %v1420_v57 }
  0x81   :  { %1233 = vmatpush3.bf16.msra.mxu1 %v1441_v10 }
  0x82   :  { %849 = vmatmul.mubr.bf16.vlgmr.msra.gmra.mrb[0].mxu0 %v1086_v58 }
 0x117   :  { %v768_v11 = vpop.f32.mrb[0].mxu1 }
 0x118   :  { %v770_v12 = vpop.f32.mrb[1].mxu1  ;;  %v769_v26 = vadd.f32 %v768_v11, %v142_v24 }
 0x119   :  { %v772_v13 = vpop.f32.mrb[2].mxu1  ;;  %v771_v27 = vadd.f32 %v770_v12, %v146_v25 }
 0x11a   :  { %v773_v14 = vpop.f32.mrb[3].mxu1 }
 0x137   :  { %v891_v15 = vpop.f32.mrb[4].mxu1 }
 0x138   :  { %v893_v16 = vpop.f32.mrb[5].mxu1 }
 0x139   :  { %v895_v17 = vpop.f32.mrb[6].mxu1 }
 0x13a   :  { %v896_v18 = vpop.f32.mrb[7].mxu1 }
 0x155   :  { %v850_v28 = vpop.f32.mrb[0].mxu0 }
 0x156   :  { %v1241_v29 = vadd.f32 %v850_v28, %v769_v26  ;;  %v852_v30 = vpop.f32.mrb[1].mxu0 }
 0x157   :  { %v1244_v31 = vadd.f32 %v852_v30, %v771_v27  ;;  %v854_v32 = vpop.f32.mrb[2].mxu0 }
 0x158   :  { %v1242_v33 = vadd.f32 %v1241_v29, %v891_v15  ;;  %v855_v34 = vpop.f32.mrb[3].mxu0 }
 0x159   :  { %v1245_v35 = vadd.f32 %v1244_v31, %v893_v16 }
 0x15a   :  { %v898_v36 = vmax.f32 %v1242_v33, 0.0 }
 0x15b   :  { %v899_v37 = vmax.f32 %v1245_v35, 0.0 }
 0x15c   :  { %v900_v39 = vpack.c.bf16 %v898_v36, %v898_v36 }
 0x15d   :  { %v901_v38 = vpack.c.bf16 %v899_v37, %v899_v37 }
 0x15f   :  { %1069 = vmatprep.mubr.bf16.mxu1 %v901_v38 }
 0x160   :  { %1070 = vmatmul.mubr.bf16.vlgmr.msra.gmra.mrb[8].mxu1 %v900_v39 }
 0x233   :  { %v1234_v40 = vpop.f32.mrb[8].mxu1 }
 0x234   :  { %v1235_v42 = vpop.f32.mrb[9].mxu1 }
 0x235   :  { %v1236_v43 = vadd.f32 %v1235_v42, %v1234_v40  ;;  %v1237_v44 = vpop.f32.mrb[10].mxu1 }
 0x236   :  { %v1238_v45 = vpop.f32.mrb[11].mxu1 }
 0x237   :  { %v1072_v46 = vadd.f32 %v1236_v43, %v1201_v41 }
 0x239   :  { %1077 = vst [vmem:[%s1895_s5] sm:$0xff] %v1072_v46 }

</bundles_post_ra>
